<compile_context>
chip_gen: v7x
topology: tpu7x:2x2x1
jax: 0.10.0
libtpu: 0.0.40
codegen_flags: <defaults>
</compile_context>

<pallas_src>
import functools

import jax
import jax.numpy as jnp
from jax import lax
from jax.experimental import pallas as pl
from jax.experimental.pallas import tpu as pltpu

_LANES = 128
_MAX_TILE_ROWS = 2048     # (2048,128) f32 = 1 MiB / input / pipeline buffer
_SMALL_N = 64 * 1024      # below this the gridded pipeline is launch-overhead dominated
_N_SPLIT = 2              # leading "parallel" grid axis (2 TCs on v7x; no-op cost on 1-TC chips)


def _round_up(x, m):
    return (x + m - 1) // m * m


def _sublane_multiple(dtype):
    # second-to-last block dim must respect the dtype's sublane packing
    return {4: 8, 2: 16, 1: 32}.get(jnp.dtype(dtype).itemsize, 8)


def _bce_abs_sum(dom, org):
    """|sum of per-element BCE terms| (mean / weight folded in by the caller)."""
    d = dom.astype(jnp.float32)
    o = org.astype(jnp.float32)
    log_d = jnp.maximum(jnp.log(d), -100.0)          # torch.nn.BCELoss log clamp
    log_1md = jnp.maximum(jnp.log(1.0 - d), -100.0)
    return jnp.abs(jnp.sum(-(o * log_d + (1.0 - o) * log_1md)))


# --------------------------------------------------------------------------------------
# Kernels
# --------------------------------------------------------------------------------------
def _domain_only_kernel(dom_ref, org_ref, out_ref, *, domain_coeff):
    out_ref[0, 0] = _bce_abs_sum(dom_ref[...], org_ref[...]) * domain_coeff


def _source_small_kernel(t_ref, p_ref, dom_ref, org_ref, out_ref, *,
                         loss_type, point_coeff, domain_coeff):
    diff = p_ref[...].astype(jnp.float32) - t_ref[...].astype(jnp.float32)
    vals = jnp.abs(diff) if loss_type == 'mae' else diff * diff
    bce = _bce_abs_sum(dom_ref[...], org_ref[...])
    out_ref[0, 0] = jnp.sum(vals) * point_coeff + bce * domain_coeff


def _point_partial_kernel(t_ref, p_ref, part_ref, *,
                          loss_type, tile_rows, rows, k_steps, needs_mask):
    """Per-split partial point-loss sums into a (1,8,128) resident output block."""
    c = pl.program_id(0)          # core-parallel split
    k = pl.program_id(1)          # sequential reduction step within the split

    @pl.when(k == 0)
    def _():
        part_ref[...] = jnp.zeros_like(part_ref)

    diff = p_ref[...].astype(jnp.float32) - t_ref[...].astype(jnp.float32)
    vals = jnp.abs(diff) if loss_type == 'mae' else diff * diff

    def _fold(v):                 # (tile_rows,128) -> (1,8,128): pure vreg adds
        return jnp.sum(v.reshape(-1, 8, _LANES), axis=0)[None]

    if not needs_mask:
        part_ref[...] += _fold(vals)
    else:
        g = c * k_steps + k                  # global (unclamped) tile index
        g_full = rows // tile_rows           # tiles strictly below this are fully valid

        @pl.when(g < g_full)
        def _():
            part_ref[...] += _fold(vals)

        @pl.when(g >= g_full)                # partial last tile / overflow step
        def _():
            row_ids = lax.broadcasted_iota(jnp.int32, (tile_rows, _LANES), 0)
            valid = (g * tile_rows + row_ids) < rows
            part_ref[...] += _fold(jnp.where(valid, vals, 0.0))


# --------------------------------------------------------------------------------------
# Wrappers
# --------------------------------------------------------------------------------------
def _domain_loss(domain_output, org, w_domain):
    n_dom = float(org.size)
    domain_coeff = float(w_domain) / n_dom            # mean + weight folded into one mult
    dom2 = domain_output.reshape(1, -1)               # lane-dense (1, B)
    org2 = org.reshape(1, -1)
    out = pl.pallas_call(
        functools.partial(_domain_only_kernel, domain_coeff=domain_coeff),
        out_shape=jax.ShapeDtypeStruct((1, 1), jnp.float32),
        in_specs=[pl.BlockSpec(memory_space=pltpu.MemorySpace.VMEM)] * 2,
        out_specs=pl.BlockSpec(memory_space=pltpu.MemorySpace.SMEM),
    )(dom2, org2)
    return out[0, 0]


def _point_sum_large(target, pred, loss_type):
    """Gridded, double-buffered, 2-way core-parallel sum of |diff| or diff^2."""
    n_point = int(target.size)
    sub = max(_sublane_multiple(target.dtype), _sublane_multiple(pred.dtype))

    if n_point % (sub * _LANES) == 0:
        # aligned: a pure reshape is free for contiguous data -> no extra HBM traffic
        rows = n_point // _LANES
        t2 = target.reshape(rows, _LANES)
        p2 = pred.reshape(rows, _LANES)
    else:
        # minimal pad (< sub*128 elements) only when unaligned; pads are zero -> diff = 0
        rows = _round_up(pl.cdiv(n_point, _LANES), sub)
        pad = rows * _LANES - n_point
        t2 = jnp.pad(target.reshape(-1), (0, pad)).reshape(rows, _LANES)
        p2 = jnp.pad(pred.reshape(-1), (0, pad)).reshape(rows, _LANES)

    tile_rows = min(_MAX_TILE_ROWS, _round_up(pl.cdiv(rows, _N_SPLIT), sub))
    total_tiles = pl.cdiv(rows, tile_rows)
    k_steps = pl.cdiv(total_tiles, _N_SPLIT)
    needs_mask = (_N_SPLIT * k_steps * tile_rows != rows)

    def in_map(c, k):
        # clamp keeps overflow steps in-bounds; their contribution is masked to zero
        return (jnp.minimum(c * k_steps + k, total_tiles - 1), 0)

    kernel = functools.partial(
        _point_partial_kernel, loss_type=loss_type, tile_rows=tile_rows,
        rows=rows, k_steps=k_steps, needs_mask=needs_mask)

    partials = pl.pallas_call(
        kernel,
        out_shape=jax.ShapeDtypeStruct((_N_SPLIT, 8, _LANES), jnp.float32),
        grid=(_N_SPLIT, k_steps),
        in_specs=[pl.BlockSpec((tile_rows, _LANES), in_map),
                  pl.BlockSpec((tile_rows, _LANES), in_map)],
        out_specs=pl.BlockSpec((1, 8, _LANES), lambda c, k: (c, 0, 0)),
        compiler_params=pltpu.CompilerParams(
            dimension_semantics=("parallel", "arbitrary")),
    )(t2, p2)
    return jnp.sum(partials)


def cal_loss(method, target, pred, domain_output, org,
             loss_type='mae', loss_weights=(1.0, 1.0, 1.0)):
    """JAX/Pallas equivalent of Cal_loss(loss_type).forward(method, target, pred,
    domain_output, input, img_name, id, org, ...). `input`/`img_name`/`id` are unused
    because the vein-loss branch is hard-disabled in the reference."""
    # TODO(synk): vein_loss_class branch is dead code in the reference forward; not implemented.
    assert loss_type in ('mae', 'mse')
    w_point, _w_vein, w_domain = loss_weights
    n_point = int(target.size)

    if method != 'source' or n_point == 0:
        # point term is multiplied by zero -> never DMA target/pred at all
        return _domain_loss(domain_output, org, w_domain)

    point_coeff = float(w_point) / float(n_point)
    n_dom = float(org.size)
    domain_coeff = float(w_domain) / n_dom

    if n_point <= _SMALL_N:
        # launch-overhead regime: one ungridded call, point sum + BCE fused
        t2 = target.reshape(1, -1)
        p2 = pred.reshape(1, -1)
        dom2 = domain_output.reshape(1, -1)
        org2 = org.reshape(1, -1)
        kernel = functools.partial(_source_small_kernel, loss_type=loss_type,
                                   point_coeff=point_coeff, domain_coeff=domain_coeff)
        out = pl.pallas_call(
            kernel,
            out_shape=jax.ShapeDtypeStruct((1, 1), jnp.float32),
            in_specs=[pl.BlockSpec(memory_space=pltpu.MemorySpace.VMEM)] * 4,
            out_specs=pl.BlockSpec(memory_space=pltpu.MemorySpace.SMEM),
        )(t2, p2, dom2, org2)
        return out[0, 0]

    # large path: gridded HBM-bound reduction + tiny domain kernel, combined on host side
    point_sum = _point_sum_large(target, pred, loss_type)
    return point_sum * point_coeff + _domain_loss(domain_output, org, w_domain)


if __name__ == "__main__":
    key = jax.random.PRNGKey(0)
    k_t, k_p, k_d, k_o, k_tl, k_pl = jax.random.split(key, 6)

    # ---- small shapes (fast path): batch=2, 4 keypoints x 2 coords ----
    B, P = 2, 8
    target = jax.random.uniform(k_t, (B, P), dtype=jnp.float32)
    pred = jax.random.uniform(k_p, (B, P), dtype=jnp.float32)
    domain_output = jax.random.uniform(k_d, (B, 1), dtype=jnp.float32,
                                       minval=0.05, maxval=0.95)
    org = (jax.random.uniform(k_o, (B, 1)) > 0.5).astype(jnp.float32)

    total_src = cal_loss('source', target, pred, domain_output, org,
                         loss_type='mae', loss_weights=(1.0, 1.0, 1.0))
    total_tgt = cal_loss('target', target, pred, domain_output, org,
                         loss_type='mse', loss_weights=(1.0, 1.0, 1.0))
    jax.block_until_ready((total_src, total_tgt))

    ref_bce = jnp.mean(-(org * jnp.log(domain_output)
                         + (1.0 - org) * jnp.log(1.0 - domain_output)))
    ref_src = jnp.sum(jnp.abs(pred - target)) / target.size + ref_bce
    assert jnp.allclose(total_src, ref_src, rtol=1e-5, atol=1e-5)
    assert jnp.allclose(total_tgt, ref_bce, rtol=1e-5, atol=1e-5)

    # ---- larger shape: exercises the gridded, core-parallel, masked-partial-tile path ----
    Tb, Tp = 3, 33000
    target_l = jax.random.uniform(k_tl, (Tb, Tp), dtype=jnp.float32)
    pred_l = jax.random.uniform(k_pl, (Tb, Tp), dtype=jnp.float32)
    total_big = cal_loss('source', target_l, pred_l, domain_output, org,
                         loss_type='mse', loss_weights=(1.0, 1.0, 1.0))
    jax.block_until_ready(total_big)
    ref_big = jnp.sum((pred_l - target_l) ** 2) / target_l.size + ref_bce
    assert jnp.allclose(total_big, ref_big, rtol=1e-4, atol=1e-5)

    print("KERNEL_OK")
</pallas_src>

<mosaic_0001>
module attributes {stable_mosaic.version = 11 : i64} {
  func.func @_source_small_kernel(%arg0: memref<1x16xf32, #tpu.memory_space<vmem>>, %arg1: memref<1x16xf32, #tpu.memory_space<vmem>>, %arg2: memref<1x2xf32, #tpu.memory_space<vmem>>, %arg3: memref<1x2xf32, #tpu.memory_space<vmem>>, %arg4: memref<1x1xf32, #tpu.memory_space<smem>>) attributes {dimension_semantics = [], scalar_prefetch = 0 : i64, scratch_operands = 0 : i64, tpu.core_type = #tpu.core_type<tc>} {
    %c0 = arith.constant 0 : index
    %c0_0 = arith.constant 0 : index
    %0 = vector.load %arg1[%c0, %c0_0] : memref<1x16xf32, #tpu.memory_space<vmem>>, vector<1x16xf32>
    %c0_1 = arith.constant 0 : index
    %c0_2 = arith.constant 0 : index
    %1 = vector.load %arg0[%c0_1, %c0_2] : memref<1x16xf32, #tpu.memory_space<vmem>>, vector<1x16xf32>
    %2 = arith.subf %0, %1 : vector<1x16xf32>
    %3 = math.absf %2 : vector<1x16xf32>
    %c0_3 = arith.constant 0 : index
    %c0_4 = arith.constant 0 : index
    %4 = vector.load %arg2[%c0_3, %c0_4] : memref<1x2xf32, #tpu.memory_space<vmem>>, vector<1x2xf32>
    %c0_5 = arith.constant 0 : index
    %c0_6 = arith.constant 0 : index
    %5 = vector.load %arg3[%c0_5, %c0_6] : memref<1x2xf32, #tpu.memory_space<vmem>>, vector<1x2xf32>
    %6 = math.log %4 : vector<1x2xf32>
    %cst = arith.constant -1.000000e+02 : f32
    %7 = vector.broadcast %cst : f32 to vector<1x2xf32>
    %8 = arith.maximumf %6, %7 : vector<1x2xf32>
    %cst_7 = arith.constant 1.000000e+00 : f32
    %9 = vector.broadcast %cst_7 : f32 to vector<1x2xf32>
    %10 = arith.subf %9, %4 : vector<1x2xf32>
    %11 = math.log %10 : vector<1x2xf32>
    %cst_8 = arith.constant -1.000000e+02 : f32
    %12 = vector.broadcast %cst_8 : f32 to vector<1x2xf32>
    %13 = arith.maximumf %11, %12 : vector<1x2xf32>
    %14 = arith.mulf %5, %8 : vector<1x2xf32>
    %cst_9 = arith.constant 1.000000e+00 : f32
    %15 = vector.broadcast %cst_9 : f32 to vector<1x2xf32>
    %16 = arith.subf %15, %5 : vector<1x2xf32>
    %17 = arith.mulf %16, %13 : vector<1x2xf32>
    %18 = arith.addf %14, %17 : vector<1x2xf32>
    %cst_10 = arith.constant 0.000000e+00 : f32
    %19 = vector.broadcast %cst_10 : f32 to vector<1x2xf32>
    %20 = arith.subf %19, %18 : vector<1x2xf32>
    %21 = vector.shape_cast %20 : vector<1x2xf32> to vector<1x1x2xf32>
    %cst_11 = arith.constant dense<0.000000e+00> : vector<1xf32>
    %22 = vector.multi_reduction <add>, %21, %cst_11 [1, 2] : vector<1x1x2xf32> to vector<1xf32>
    %23 = vector.shape_cast %22 : vector<1xf32> to vector<1x1x1xf32>
    %24 = vector.extract %23[0, 0, 0] : f32 from vector<1x1x1xf32>
    %25 = math.absf %24 : f32
    %26 = vector.shape_cast %3 : vector<1x16xf32> to vector<1x1x16xf32>
    %cst_12 = arith.constant dense<0.000000e+00> : vector<1xf32>
    %27 = vector.multi_reduction <add>, %26, %cst_12 [1, 2] : vector<1x1x16xf32> to vector<1xf32>
    %28 = vector.shape_cast %27 : vector<1xf32> to vector<1x1x1xf32>
    %29 = vector.extract %28[0, 0, 0] : f32 from vector<1x1x1xf32>
    %cst_13 = arith.constant 6.250000e-02 : f32
    %30 = arith.mulf %29, %cst_13 : f32
    %cst_14 = arith.constant 5.000000e-01 : f32
    %31 = arith.mulf %25, %cst_14 : f32
    %32 = arith.addf %30, %31 : f32
    %c0_15 = arith.constant 0 : index
    %c0_16 = arith.constant 0 : index
    %33 = memref.load %arg4[%c0_15, %c0_16] : memref<1x1xf32, #tpu.memory_space<smem>>
    memref.store %32, %arg4[%c0_15, %c0_16] : memref<1x1xf32, #tpu.memory_space<smem>>
    return
  }
}

</mosaic_0001>

<bundles_post_ra>
// kernel: tpu_custom_call.1
= control target key start
LH: loop header
LB: loop body
LE: loop exit
PB: predicated region body
PF: predicated region fallthrough
CT: control target
= control target key end

     0   :  { %9 = vsyncpa [#allocation3], 0  ;;  %s196_s0 = inlined_call_operand.hbm [shape: f32[1,16], index: 0, kind: input, shape index: {}]   ;;  %s197_s1 = inlined_call_operand.vmem [shape: f32[1,16], index: 1, kind: input, shape index: {}]   ;;  %s198_s2 = inlined_call_operand.vmem [shape: f32[1,2], index: 2, kind: input, shape index: {}]   ;;  %s199_s3 = inlined_call_operand.vmem [shape: f32[1,2], index: 3, kind: input, shape index: {}]   ;;  %s200_s4 = inlined_call_operand.hbm [shape: f32[1,1], index: 4, kind: output, shape index: {}]  }
   0x1   :  { %10 = vsyncpa [#allocation4], 0  ;;  %s136_s15 = smov [#allocation2]   ;;  %s100_s19 = scalar_lea.hbm %s196_s0, 16 }
   0x2   :  { %s17_s16 = sshll.u32 %s136_s15, 4  ;;  %p101_p0 = scmp.ne.s32.totalorder %s196_s0, %s100_s19  ;;  %s18_s16 = int_to_ptr.vmem [resolvable:$true] %s17_s16 }
   0x3   :  { %p104_p1 = scmp.lt.u32.totalorder %s100_s19, %s196_s0 }
   0x5   :  { %p106_p2 = pnand %p104_p1, %p101_p0 }
   0x7   :  { %109 = shalt.err (!%p106_p2)
}
   0x8   :  { %s110_s24 = scalar_lea.vmem %s18_s16, 16  ;;  %s114_s25 = scalar_lea.vmem %s18_s16, 32 }
   0x9   :  { %p111_p3 = scmp.ne.s32.totalorder %s18_s16, %s110_s24  ;;  %p115_p4 = scmp.lt.s32.totalorder %s18_s16, %s18_s16 }
   0xa   :  { %p116_p5 = scmp.lt.s32.totalorder %s114_s25, %s110_s24 }
   0xc   :  { %p117_p6 = por %p116_p5, %p115_p4 }
   0xe   :  { %p118_p7 = pnand %p117_p6, %p111_p3 }
  0x10   :  { %121 = shalt.err (!%p118_p7)
}
  0x11   :  { %20 = dma.hbm_to_vmem [thread:$0]  %s196_s0, 16, %s18_s16, [#allocation3]  }
  0x12   :  { %132 = dma.done.wait [#allocation3], 16  }
  0x13   :  { %133 = vsyncadd [#allocation3], 4294967280  ;;  %v34_v0 = vld [vmem:[%s198_s2] sm:$0x1]  ;;  %vm48_vm0 = vcmask 8192   ;;  %vm60_vm1 = vcmask 122880  }
  0x14   :  { %96 = vlog2.f32 %v34_v0  ;;  %v39_v1 = vsub.f32 1.0, %v34_v0  ;;  %v35_v3 = vld [vmem:[%s199_s3] sm:$0x1]  ;;  %s122_s12 = scalar_lea.hbm %s200_s4, 16 }
  0x15   :  { %v44_v8 = vsub.f32 1.0, %v35_v3  ;;  %v30_v9 = vld [vmem:[%s197_s1] sm:$0x1]  ;;  %p123_p8 = scmp.ne.s32.totalorder %s200_s4, %s122_s12  ;;  %p126_p9 = scmp.lt.u32.totalorder %s122_s12, %s200_s4 }
  0x16   :  { %98 = vlog2.f32 %v39_v1  ;;  %v31_v10 = vld [vmem:[#allocation2] sm:$0x1] }
  0x17   :  { %v32_v14 = vsub.f32 %v30_v9, %v31_v10  ;;  %p128_p10 = pnand %p126_p9, %p123_p8 }
  0x19   :  { %v33_v17 = vand.u32 2147483647, %v32_v14 }
  0x1b   :  { %v61_v19 = vsel %vm60_vm1, %v33_v17, 0.0 }
  0x1e   :  { %v97_v2 = vpop.eup %96 }
  0x1f   :  { %v37_v4 = vmul.f32 0.6931472, %v97_v2 }
  0x20   :  { %v99_v5 = vpop.eup %98 }
  0x21   :  { %v38_v6 = vmax.f32 %v37_v4, -100.0  ;;  %v41_v7 = vmul.f32 0.6931472, %v99_v5 }
  0x23   :  { %v42_v11 = vmax.f32 %v41_v7, -100.0  ;;  %v43_v12 = vmul.f32 %v38_v6, %v35_v3 }
  0x25   :  { %v45_v13 = vmul.f32 %v44_v8, %v42_v11 }
  0x27   :  { %v46_v15 = vadd.f32 %v45_v13, %v43_v12 }
  0x29   :  { %v47_v16 = vsub.f32 0.0, %v46_v15 }
  0x2b   :  { %v49_v18 = vsel %vm48_vm0, %v47_v16, 0.0 }
  0x2c   :  { %50 = vadd.xlane.f32.xlu0 %v49_v18 }
  0x30   :  { %62 = vadd.xlane.f32.xlu0 %v61_v19 }
  0xb9   :  { %v51_v20 = vpop.xlane.xlu0 %50 }
  0xba   :  { %v52_v21 = vrot.slane %v51_v20, 4 }
  0xbc   :  { %v53_v22 = vadd.f32 %v52_v21, %v51_v20 }
  0xbd   :  { %v63_v23 = vpop.xlane.xlu0 %62 }
  0xbe   :  { %v54_v24 = vrot.slane %v53_v22, 2  ;;  %v64_v25 = vrot.slane %v63_v23, 4 }
  0xc0   :  { %v65_v26 = vadd.f32 %v64_v25, %v63_v23  ;;  %v55_v27 = vadd.f32 %v54_v24, %v53_v22 }
  0xc2   :  { %v66_v28 = vrot.slane %v65_v26, 2  ;;  %v56_v29 = vrot.slane %v55_v27, 1 }
  0xc4   :  { %v67_v30 = vadd.f32 %v66_v28, %v65_v26  ;;  %v57_v31 = vadd.f32 %v56_v29, %v55_v27 }
  0xc6   :  { %90 = vpush %v57_v31  ;;  %v68_v32 = vrot.slane %v67_v30, 1 }
  0xc8   :  { %v69_v33 = vadd.f32 %v68_v32, %v67_v30 }
  0xca   :  { %92 = vpush %v69_v33 }
  0xf7   :  { %s91_s1 = spop %90 }
  0xf8   :  { %s59_s2 = sand.u32 2147483647, %s91_s1 }
  0xf9   :  { %s72_s3 = smul.f32 0.5, %s59_s2 }
  0xfb   :  { %s93_s7 = spop %92 }
  0xfc   :  { %s71_s8 = smul.f32 0.0625, %s93_s7 }
  0xfe   :  { %s73_s9 = sadd.f32 %s72_s3, %s71_s8 }
 0x100   :  { %75 = sst [smem:[#allocation5]] %s73_s9 }
 0x101   :  { %131 = shalt.err (!%p128_p10)
}
 0x102   :  { %s137_s17 = smov [#allocation5]  }
 0x103   :  { %83 = dma.smem_to_hbm %s137_s17, 16, %s200_s4, [#allocation4]  }
 0x104   :  { %134 = dma.done.wait [#allocation4], 16  }
 0x105   :  { %135 = vsyncadd [#allocation4], 4294967280 }
 0x106   :  { %87 = sfence }
 0x107   :  { %88 = vsyncpa [#allocation3], 1 }
 0x108   :  { %89 = vsyncpa [#allocation4], 1 }

</bundles_post_ra>
